<compile_context>
chip_gen: v6e
topology: v6e:2x2x1
jax: 0.10.0
libtpu: 0.0.40
codegen_flags: <defaults>
</compile_context>

<pallas_src>
import math

import jax
import jax.numpy as jnp
from jax.experimental import pallas as pl
from jax.experimental.pallas import tpu as pltpu


def _round_up(x, m):
    return (x + m - 1) // m * m


def _orthogonal(key, shape, gain=1.0):
    """Deterministic stand-in for torch.nn.init.orthogonal_ on a 2D weight."""
    rows, cols = shape
    n = max(rows, cols)
    a = jax.random.normal(key, (n, n), dtype=jnp.float32)
    q, r = jnp.linalg.qr(a)
    d = jnp.diagonal(r)
    q = q * jnp.where(d >= 0.0, 1.0, -1.0)[None, :]  # copysign-style (never 0)
    return (gain * q[:rows, :cols]).astype(jnp.float32)


def _make_fused_kernel(num_layers, H, W, out_pad):
    """Builds the fused (ReLU -> conv3x3 valid) x num_layers kernel.

    One grid step = one batch element.  The activation lives in VMEM for the
    whole layer chain.  Layout: activation is flattened on the width-W grid,
    (C, h*W); the valid width shrinks by 2 per layer but the grid width W is
    kept constant, so the 3x3 taps are pure lane shifts of the flat array.
    """

    def kernel(x_ref, w_ref, b_ref, o_ref):
        # x_ref: (1, C, H*W)  input activation (f32), flattened width-W grid
        # w_ref: (L, F, 9F)   bf16 conv weights, K ordered (dy, dx, cin)
        # b_ref: (L, F, 1)    f32 biases
        # o_ref: (1, F, out_pad)
        a = x_ref[0]                                   # (C, H*W)
        h = H                                          # current valid height
        for l in range(num_layers):
            # ReLU once on the un-duplicated activation, single bf16 cast for
            # the MXU feed (f32 accumulate below).
            a = jnp.maximum(a, 0.0).astype(jnp.bfloat16)
            # 2-lane halo pad: the (dy=2, dx=2) tap reads 2 lanes past h*W.
            a = jnp.concatenate(
                [a, jnp.zeros((a.shape[0], 2), jnp.bfloat16)], axis=1)
            p_out = (h - 2) * W                        # flat output length
            # In-kernel im2col: 9 lane-shifted views -> (9C, p_out) patches.
            shifted = [a[:, dy * W + dx: dy * W + dx + p_out]
                       for dy in range(3) for dx in range(3)]
            patches = jnp.concatenate(shifted, axis=0)
            acc = jnp.dot(w_ref[l], patches,
                          preferred_element_type=jnp.float32)  # (F, p_out)
            a = acc + b_ref[l]                         # f32 bias add
            h -= 2
        # Lane-dense (unmasked) store: pad the flat slab to out_pad lanes.
        pad = out_pad - a.shape[-1]
        if pad:
            a = jnp.concatenate(
                [a, jnp.zeros((a.shape[0], pad), a.dtype)], axis=1)
        o_ref[0] = a.astype(o_ref.dtype)

    return kernel


def head_cnn_forward(x, weights, biases):
    """[ReLU -> Conv2d(F, F, 3, valid)] * L then Flatten, NCHW in / (N, -1) out."""
    N, C, H, W = x.shape
    L = len(weights)
    if L == 0:
        return x.reshape(N, -1)

    F = weights[0].shape[0]
    assert C == F, "HeadCNN requires in-channels == num_filters when num_layers > 0"
    K = 9 * C
    HW = H * W
    H_L, W_L = H - 2 * L, W - 2 * L
    out_valid = H_L * W                      # flat length kept on width-W grid
    out_pad = max(_round_up(out_valid, 128), 128)

    # (L, F, 9C) with K ordered (dy, dx, cin) to match the in-kernel taps.
    w_stack = jnp.stack(
        [jnp.transpose(w, (0, 2, 3, 1)).reshape(F, K) for w in weights]
    ).astype(jnp.bfloat16)
    b_stack = jnp.stack([b.reshape(F, 1) for b in biases]).astype(jnp.float32)

    x_flat = x.reshape(N, C, HW)             # free reshape of contiguous NCHW

    kernel = _make_fused_kernel(L, H, W, out_pad)

    flops = sum(2 * N * F * K * (H - 2 * l - 2) * W for l in range(L))
    bytes_accessed = (x_flat.size * x_flat.dtype.itemsize
                      + w_stack.size * 2 + b_stack.size * 4
                      + N * F * out_pad * x.dtype.itemsize)
    cost = pl.CostEstimate(flops=flops, transcendentals=0,
                           bytes_accessed=bytes_accessed)

    # Per-step VMEM: double-buffered in/out blocks + resident weights + the
    # in-kernel patches/activation temporaries, with headroom; capped well
    # under v7x's 64 MiB physical VMEM.
    step_bytes = (2 * 4 * C * HW + 2 * 4 * F * out_pad        # in/out blocks
                  + 2 * L * F * K + 4 * L * F                 # weights/bias
                  + 2 * K * HW + 3 * 4 * C * HW)              # temporaries
    vmem_limit = int(min(max(4 * step_bytes, 32 * 1024 * 1024),
                         48 * 1024 * 1024))

    out = pl.pallas_call(
        kernel,
        out_shape=jax.ShapeDtypeStruct((N, F, out_pad), x.dtype),
        grid_spec=pltpu.PrefetchScalarGridSpec(
            num_scalar_prefetch=0,
            grid=(N,),
            in_specs=[
                pl.BlockSpec((1, C, HW), lambda n: (n, 0, 0)),
                pl.BlockSpec((L, F, K), lambda n: (0, 0, 0)),
                pl.BlockSpec((L, F, 1), lambda n: (0, 0, 0)),
            ],
            out_specs=pl.BlockSpec((1, F, out_pad), lambda n: (n, 0, 0)),
        ),
        compiler_params=pltpu.CompilerParams(
            dimension_semantics=("parallel",),
            vmem_limit_bytes=vmem_limit,
        ),
        cost_estimate=cost,
    )(x_flat, w_stack, b_stack)

    # Drop the junk grid columns (valid width shrank by 2 per layer) and
    # flatten in NCHW order; a cheap XLA slice over the small final output.
    out = out[:, :, :out_valid].reshape(N, F, H_L, W)[:, :, :, :W_L]
    return out.reshape(N, -1)


class HeadCNN:
    """JAX/Pallas port of HeadCNN(in_shape, num_layers, num_filters)."""

    def __init__(self, in_shape, num_layers=0, num_filters=32,
                 key=jax.random.PRNGKey(42)):
        self.num_layers = num_layers
        self.num_filters = num_filters
        self.weights = []
        self.biases = []
        gain = math.sqrt(2.0)  # nn.init.calculate_gain('relu')
        c, h, w = in_shape
        for _ in range(num_layers):
            key, sub = jax.random.split(key)
            # torch orthogonal_ flattens the (out, in, kh, kw) weight to 2D
            w2d = _orthogonal(sub, (num_filters, num_filters * 9), gain)
            self.weights.append(w2d.reshape(num_filters, num_filters, 3, 3))
            self.biases.append(jnp.zeros((num_filters,), jnp.float32))
            h, w = h - 2, w - 2
            c = num_filters
        # analytic equivalent of _get_out_shape (Flatten of (c, h, w))
        self.out_shape = (c * h * w,)

    def __call__(self, x):
        return head_cnn_forward(x, self.weights, self.biases)


if __name__ == "__main__":
    key = jax.random.PRNGKey(0)
    N, C, H, W = 2, 32, 16, 16  # channels == num_filters, small spatial
    x = jax.random.normal(key, (N, C, H, W), dtype=jnp.float32)

    def ref_forward(xin, weights, biases):
        for wk, bk in zip(weights, biases):
            xin = jnp.maximum(xin, 0.0)
            xin = jax.lax.conv_general_dilated(
                xin, wk, window_strides=(1, 1), padding="VALID",
                dimension_numbers=("NCHW", "OIHW", "NCHW"),
                precision=jax.lax.Precision.HIGHEST)
            xin = xin + bk[None, :, None, None]
        return xin.reshape(xin.shape[0], -1)

    # bf16 MXU operands (f32 accumulate) vs. f32-HIGHEST reference -> loose tol
    TOL = 5e-2

    # num_layers=1: ReLU -> Conv3x3 -> Flatten
    model = HeadCNN(in_shape=(C, H, W), num_layers=1, num_filters=C)
    y = jax.block_until_ready(model(x))
    ref = ref_forward(x, model.weights, model.biases)
    assert y.shape == (N, C * (H - 2) * (W - 2)), y.shape
    assert jnp.allclose(y, ref, atol=TOL, rtol=TOL), float(
        jnp.max(jnp.abs(y - ref)))

    # num_layers=2 exercises the fused multi-layer path (single pallas_call)
    model2 = HeadCNN(in_shape=(C, H, W), num_layers=2, num_filters=C,
                     key=jax.random.PRNGKey(7))
    y2 = jax.block_until_ready(model2(x))
    ref2 = ref_forward(x, model2.weights, model2.biases)
    assert y2.shape == (N, C * (H - 4) * (W - 4)), y2.shape
    assert jnp.allclose(y2, ref2, atol=TOL, rtol=TOL), float(
        jnp.max(jnp.abs(y2 - ref2)))

    # default num_layers=0 is just Flatten (no kernel involved)
    model0 = HeadCNN(in_shape=(C, H, W), num_layers=0, num_filters=C)
    assert jnp.allclose(model0(x), x.reshape(N, -1))

    print("KERNEL_OK")
</pallas_src>

<mosaic_0001>
module attributes {stable_mosaic.version = 11 : i64} {
  func.func @kernel(%arg0: i32, %arg1: memref<1x32x256xf32, #tpu.memory_space<vmem>>, %arg2: memref<1x32x288xbf16, #tpu.memory_space<vmem>>, %arg3: memref<1x32x1xf32, #tpu.memory_space<vmem>>, %arg4: memref<1x32x256xf32, #tpu.memory_space<vmem>>) attributes {dimension_semantics = [#tpu.dimension_semantics<parallel>], iteration_bounds = array<i64: 2>, scalar_prefetch = 0 : i64, scratch_operands = 0 : i64, tpu.core_type = #tpu.core_type<tc>, window_params = [{transform_indices = @transform_0, window_bounds = array<i64: 1, 32, 256>}, {pipeline_mode = #tpu.pipeline_mode<synchronous>, transform_indices = @transform_1, window_bounds = array<i64: 1, 32, 288>}, {pipeline_mode = #tpu.pipeline_mode<synchronous>, transform_indices = @transform_2, window_bounds = array<i64: 1, 32, 1>}, {transform_indices = @transform_3, window_bounds = array<i64: 1, 32, 256>}]} {
    %c0 = arith.constant 0 : index
    %c0_0 = arith.constant 0 : index
    %c0_1 = arith.constant 0 : index
    %0 = vector.load %arg1[%c0, %c0_0, %c0_1] : memref<1x32x256xf32, #tpu.memory_space<vmem>>, vector<1x32x256xf32>
    %1 = vector.shape_cast %0 : vector<1x32x256xf32> to vector<32x256xf32>
    %cst = arith.constant 0.000000e+00 : f32
    %2 = vector.broadcast %cst : f32 to vector<32x256xf32>
    %3 = arith.maximumf %1, %2 : vector<32x256xf32>
    %4 = arith.truncf %3 : vector<32x256xf32> to vector<32x256xbf16>
    %cst_2 = arith.constant 0.000000e+00 : bf16
    %5 = vector.broadcast %cst_2 : bf16 to vector<32x2xbf16>
    %6 = tpu.concatenate %4, %5 in 1 : vector<32x256xbf16>, vector<32x2xbf16> -> vector<32x258xbf16>
    %7 = vector.extract_strided_slice %6 {offsets = [0, 0], sizes = [32, 224], strides = [1, 1]} : vector<32x258xbf16> to vector<32x224xbf16>
    %8 = vector.extract_strided_slice %6 {offsets = [0, 1], sizes = [32, 224], strides = [1, 1]} : vector<32x258xbf16> to vector<32x224xbf16>
    %9 = vector.extract_strided_slice %6 {offsets = [0, 2], sizes = [32, 224], strides = [1, 1]} : vector<32x258xbf16> to vector<32x224xbf16>
    %10 = vector.extract_strided_slice %6 {offsets = [0, 16], sizes = [32, 224], strides = [1, 1]} : vector<32x258xbf16> to vector<32x224xbf16>
    %11 = vector.extract_strided_slice %6 {offsets = [0, 17], sizes = [32, 224], strides = [1, 1]} : vector<32x258xbf16> to vector<32x224xbf16>
    %12 = vector.extract_strided_slice %6 {offsets = [0, 18], sizes = [32, 224], strides = [1, 1]} : vector<32x258xbf16> to vector<32x224xbf16>
    %13 = vector.extract_strided_slice %6 {offsets = [0, 32], sizes = [32, 224], strides = [1, 1]} : vector<32x258xbf16> to vector<32x224xbf16>
    %14 = vector.extract_strided_slice %6 {offsets = [0, 33], sizes = [32, 224], strides = [1, 1]} : vector<32x258xbf16> to vector<32x224xbf16>
    %15 = vector.extract_strided_slice %6 {offsets = [0, 34], sizes = [32, 224], strides = [1, 1]} : vector<32x258xbf16> to vector<32x224xbf16>
    %16 = tpu.concatenate %7, %8, %9, %10, %11, %12, %13, %14, %15 in 0 : vector<32x224xbf16>, vector<32x224xbf16>, vector<32x224xbf16>, vector<32x224xbf16>, vector<32x224xbf16>, vector<32x224xbf16>, vector<32x224xbf16>, vector<32x224xbf16>, vector<32x224xbf16> -> vector<288x224xbf16>
    %c0_3 = arith.constant 0 : index
    %c0_4 = arith.constant 0 : index
    %c0_5 = arith.constant 0 : index
    %17 = vector.load %arg2[%c0_3, %c0_4, %c0_5] : memref<1x32x288xbf16, #tpu.memory_space<vmem>>, vector<1x32x288xbf16>
    %18 = vector.shape_cast %17 : vector<1x32x288xbf16> to vector<32x288xbf16>
    %cst_6 = arith.constant dense<0.000000e+00> : vector<32x224xf32>
    %19 = tpu.matmul %18, %16, %cst_6 {dimension_numbers = #tpu.dot_dimension_numbers<[1], [0], [0], [1], [0, 0, 1, 1], [], []>} : vector<32x288xbf16>, vector<288x224xbf16>, vector<32x224xf32> -> vector<32x224xf32>
    %c0_7 = arith.constant 0 : index
    %c0_8 = arith.constant 0 : index
    %c0_9 = arith.constant 0 : index
    %20 = vector.load %arg3[%c0_7, %c0_8, %c0_9] : memref<1x32x1xf32, #tpu.memory_space<vmem>>, vector<1x32x1xf32>
    %21 = vector.shape_cast %20 : vector<1x32x1xf32> to vector<32x1xf32>
    %22 = vector.broadcast %21 : vector<32x1xf32> to vector<32x224xf32>
    %23 = arith.addf %19, %22 : vector<32x224xf32>
    %cst_10 = arith.constant 0.000000e+00 : f32
    %24 = vector.broadcast %cst_10 : f32 to vector<32x32xf32>
    %25 = tpu.concatenate %23, %24 in 1 : vector<32x224xf32>, vector<32x32xf32> -> vector<32x256xf32>
    %c0_11 = arith.constant 0 : index
    %c0_12 = arith.constant 0 : index
    %c0_13 = arith.constant 0 : index
    %26 = vector.load %arg4[%c0_11, %c0_12, %c0_13] : memref<1x32x256xf32, #tpu.memory_space<vmem>>, vector<1x32x256xf32>
    %27 = vector.shape_cast %26 : vector<1x32x256xf32> to vector<32x256xf32>
    %28 = vector.shape_cast %25 : vector<32x256xf32> to vector<1x32x256xf32>
    tpu.vector_store %arg4[%c0_11, %c0_12, %c0_13], %28 {strides = array<i32>} : memref<1x32x256xf32, #tpu.memory_space<vmem>>, vector<1x32x256xf32>,
    return
  }
  func.func @transform_0(%arg0: i32) -> (i32, i32, i32) {
    %c0_i32 = arith.constant 0 : i32
    %c0_i32_0 = arith.constant 0 : i32
    %c0_i32_1 = arith.constant 0 : i32
    return %arg0, %c0_i32, %c0_i32_0 : i32, i32, i32
  }
  func.func @transform_1(%arg0: i32) -> (i32, i32, i32) {
    %c0_i32 = arith.constant 0 : i32
    %c0_i32_0 = arith.constant 0 : i32
    %c0_i32_1 = arith.constant 0 : i32
    %c0_i32_2 = arith.constant 0 : i32
    return %c0_i32, %c0_i32_0, %c0_i32_1 : i32, i32, i32
  }
  func.func @transform_2(%arg0: i32) -> (i32, i32, i32) {
    %c0_i32 = arith.constant 0 : i32
    %c0_i32_0 = arith.constant 0 : i32
    %c0_i32_1 = arith.constant 0 : i32
    %c0_i32_2 = arith.constant 0 : i32
    return %c0_i32, %c0_i32_0, %c0_i32_1 : i32, i32, i32
  }
  func.func @transform_3(%arg0: i32) -> (i32, i32, i32) {
    %c0_i32 = arith.constant 0 : i32
    %c0_i32_0 = arith.constant 0 : i32
    %c0_i32_1 = arith.constant 0 : i32
    return %arg0, %c0_i32, %c0_i32_0 : i32, i32, i32
  }
}

</mosaic_0001>

<bundles_post_ra>
// kernel: tpu_custom_call.1
= control target key start
LH: loop header
LB: loop body
LE: loop exit
PB: predicated region body
PF: predicated region fallthrough
CT: control target
= control target key end

     0   :  { %8 = vsyncpa [#allocation3], 0  ;;  %s1177_s0 = inlined_call_operand.hbm [shape: f32[2,32,256], index: 0, kind: input, shape index: {}]   ;;  %s1178_s1 = inlined_call_operand.hbm [shape: bf16[1,32,288], index: 1, kind: input, shape index: {}]   ;;  %s1179_s2 = inlined_call_operand.vmem [shape: f32[1,32,1], index: 2, kind: input, shape index: {}]   ;;  %s1180_s3 = inlined_call_operand.hbm [shape: f32[2,32,256], index: 3, kind: output, shape index: {}]  }
   0x1   :  { %10 = vsyncpa [#allocation3 + $0x1], 0 }
   0x2   :  { %11 = vsyncpa [#allocation6], 0 }
   0x3   :  { %12 = vsyncpa [#allocation4], 0 }
   0x4   :  { %14 = vsyncpa [#allocation4 + $0x1], 0  ;;  %s913_s12 = smov 0   ;;  %s915_s13 = smov 0  }
   0x5   :  { %s917_s14 = smov 0   ;;  %s919_s15 = smov 0  }
   0x6 LB: > { %s934_s16 = sadd.s32 4294967295, %s873_s15   ;;  %s643_s17 = sadd.s32 4294967294, %s873_s15   ;;  %s873_s15 = sphi %s919_s15, %s1202_s15   ;;  %s869_s14 = sphi %s917_s14, %s1201_s14   ;;  %s865_s13 = sphi %s915_s13, %s1200_s13   ;;  %s861_s12 = sphi %s913_s12, %s1199_s12  }
   0x7   : > { %p40_p0 = scmp.ne.s32.totalorder %s865_s13, %s861_s12  ;;  %p1181_p1 = scmp.eq.s32.totalorder %s934_s16, 0 }
   0x8   : > { %p112_p3 = scmp.eq.s32.totalorder %s643_s17, 1  ;;  %p644_p5 = scmp.ge.s32.totalorder %s873_s15, 1 }
   0x9   : > { %p943_p4 = por %p1181_p1, %p40_p0  ;;  %p119_p7 = scmp.lt.s32.totalorder %s873_s15, 3 }
   0xa   : > { %p948_p6 = por %p112_p3, %p40_p0  ;;  %s875_s21 = smov [#allocation5]  }
   0xb   : > { %s1185_s18 = scalar_select %p943_p4, 1, 0 }
   0xc   : > { %s1186_s19 = scalar_select %p948_p6, 1, 0 }
   0xd   : > { %p953_p8 = pnand %p644_p5, %p119_p7  ;;  %s131_s22 = sshll.u32 %s875_s21, 4  ;;  %s132_s22 = int_to_ptr.vmem [resolvable:$true] %s131_s22 }
   0xe   : > { %s967_s24 = sadd.s32 1, %s873_s15   ;;  %s27_s25 = sadd.s32 1, %s869_s14 }
   0xf   : > { %s1187_s20 = scalar_select %p953_p8, 1, 0 }
  0x10   : > { %p677_p9 = pneg %p953_p8  ;;  %s24_s26 = ssub.s32 %s873_s15, %s967_s24 }
  0x11   : > { %s762_s27 = scalar_lea.vmem %s132_s22, 768  ;;  %p770_p5 = scmp.lt.s32.totalorder %s132_s22, %s132_s22 }
  0x12   : > { %p962_p11 = pnand %p677_p9, %p1181_p1  ;;  %p763_p13 = scmp.ne.s32.totalorder %s132_s22, %s762_s27 }
  0x13   : > { %p771_p7 = scmp.lt.s32.totalorder %s762_s27, %s762_s27 }
  0x14   : > { %p753_p12 = pneg %p962_p11 }
  0x15   : > { %p772_p10 = por %p771_p7, %p770_p5 }
  0x16   : > { %p765_p0 = pnand %p763_p13, %p753_p12 }
  0x18   : > { %p766_p3 = pneg %p765_p0 }
  0x1a   : > { %p773_p2 = pnand %p772_p10, %p766_p3 }
  0x1c   : > { %776 = shalt.err (!%p773_p2)
}
  0x1d   : > { %s876_s28 = smov 192   ;;  %s877_s29 = smov 12  }
  0x1e   : > { %680 = dma.hbm_to_vmem [thread:$0]  (!%p962_p11), %s1178_s1, 768, %s132_s22, [#allocation6], %s876_s28, %s876_s28, %s877_s29  }
  0x1f   : > { %p25_p9 = scmp.eq.s32.totalorder %s24_s26, 0  ;;  %p34_p12 = scmp.ne.s32.totalorder %s869_s14, %s865_s13 }
  0x20   : > { %p35_p10 = scmp.eq.s32.totalorder %s873_s15, 0  ;;  %p690_p2 = scmp.lt.s32.totalorder %s873_s15, 2 }
  0x21   : > { %s984_s5 = scalar_select %p25_p9, %s869_s14, %s27_s25  }
  0x22   : > { %p36_p13 = por %p35_p10, %p34_p12  ;;  %p1189_p0 = scmp.eq.s32.totalorder %s934_s16, 1 }
  0x23   : > { %s148_s7 = sand.u32 1, %s869_s14   ;;  %s667_s8 = sshll.u32 %s873_s15, 10 }
  0x24   : > { %p988_p3 = por %p1189_p0, %p34_p12  ;;  %s647_s9 = sshll.u32 %s148_s7, 6 }
  0x25   : > { %s997_s17 = scalar_lea.hbm %s1177_s0, %s667_s8  ;;  %s152_s21 = scalar_lea.vmem [#allocation2], %s647_s9 }
  0x26   : > { %s1190_s6 = scalar_select %p988_p3, 1, 0 }
  0x27   : > { %s159_s22 = sshll.u32 %s152_s21, 4  ;;  %p999_p11 = pnand %p690_p2, %p36_p13  ;;  %s1003_s22 = int_to_ptr.vmem [resolvable:$true] %s159_s22 }
  0x28   : > { %s1005_s25 = scalar_lea.sflag [#allocation3], %s148_s7  ;;  %s777_s26 = scalar_lea.hbm %s997_s17, 1024 }
  0x29   : > { %p778_p5 = scmp.ne.s32.totalorder %s997_s17, %s777_s26  ;;  %p779_p7 = pneg %p999_p11 }
  0x2a   : > { %s782_s29 = scalar_lea.hbm %s1177_s0, 2048  ;;  %p783_p10 = scmp.lt.s32.totalorder %s997_s17, %s1177_s0 }
  0x2b   : > { %p780_p9 = pnand %p779_p7, %p778_p5  ;;  %p784_p2 = scmp.lt.s32.totalorder %s782_s29, %s777_s26 }
  0x2d   : > { %p781_p12 = pneg %p780_p9  ;;  %p785_p13 = por %p784_p2, %p783_p10 }
  0x2f   : > { %p786_p0 = pnand %p785_p13, %p781_p12 }
  0x31   : > { %789 = shalt.err (!%p786_p0)
}
  0x32   : > { %s790_s7 = scalar_lea.vmem %s1003_s22, 1024  ;;  %s878_s8 = smov [#allocation2]  }
  0x33   : > { %p791_p1 = scmp.ne.s32.totalorder %s1003_s22, %s790_s7  ;;  %s795_s9 = sshll.u32 %s878_s8, 4  ;;  %s796_s9 = int_to_ptr.vmem [resolvable:$false] %s795_s9 }
  0x34   : > { %s797_s10 = scalar_lea.vmem %s796_s9, 2048  ;;  %p798_p9 = scmp.lt.s32.totalorder %s1003_s22, %s796_s9 }
  0x35   : > { %p793_p6 = pnand %p791_p1, %p779_p7  ;;  %p799_p3 = scmp.lt.s32.totalorder %s797_s10, %s790_s7 }
  0x37   : > { %p794_p5 = pneg %p793_p6  ;;  %p800_p4 = por %p799_p3, %p798_p9 }
  0x39   : > { %p801_p8 = pnand %p800_p4, %p794_p5 }
  0x3b   : > { %804 = shalt.err (!%p801_p8)
}
  0x3c   : > { %s879_s11 = smov 256   ;;  %s880_s21 = smov 16  }
  0x3d   : > { %684 = dma.hbm_to_vmem [thread:$0]  (!%p999_p11), %s997_s17, 1024, %s1003_s22, %s1005_s25, %s879_s11, %s879_s11, %s880_s21  }
  0x3e   : > { %p1192_p1 = scmp.ne.s32.totalorder %s1187_s20, 0 }
  0x3f   : > { %s1029_s26 = sand.u32 (!%p1192_p1), 1, %s865_s13   ;;  %p1193_p4 = scmp.ne.s32.totalorder (!%p1192_p1), %s1185_s18, 0 }
  0x40   : > { %171 = sbr.rel (%p1192_p1) target bundleno = 487 (0x1e7), region = 32  ;;  %s651_s27 = sshll.u32 (!%p1192_p1), %s1029_s26, 6 }
  0x41   : > { %s174_s28 = scalar_lea.sflag (!%p1192_p1), [#allocation3], %s1029_s26  ;;  %s177_s29 = scalar_lea.vmem (!%p1192_p1), [#allocation2], %s651_s27 }
  0x45   : > { %848 = dma.done.wait (%p1193_p4), %s174_s28, 1024  }
  0x46   : > { %850 = vsyncadd (%p1193_p4), %s174_s28, 4294966272  ;;  %p1194_p6 = scmp.eq.s32.totalorder %s934_s16, 0 }
  0x48   : > { %852 = dma.done.wait (%p1194_p6), [#allocation6], 768   ;;  %p1195_p8 = pmov %p1194_p6 }
  0x49   : > { %v881_v0 = vmov 0   ;;  %v209_v1 = vld [vmem:[%s177_s29 + $0x20] sm:$0xff]  ;;  %v211_v2 = vld [vmem:[%s177_s29 + $0x30] sm:$0xff]  ;;  %v210_v8 = vld [vmem:[%s177_s29 + $0x28] sm:$0xff]  ;;  %s882_s18 = smov 112   ;;  %s883_s20 = smov 126  }
  0x4a   : > { %854 = vsyncadd (%p1195_p8), [#allocation6], 4294966528  ;;  %512 = vmatprep.mubr.bf16.mxu1 %v881_v0  ;;  %741 = vset.pattern.permute.xlu0 %v881_v0  ;;  %v205_v3 = vld [vmem:[%s177_s29] sm:$0xff]  ;;  %v217_v4 = vmax.f32 %v209_v1, 0.0  ;;  %v219_v5 = vmax.f32 %v211_v2, 0.0  ;;  %v207_v6 = vld [vmem:[%s177_s29 + $0x10] sm:$0xff] }
  0x4b   : > { %742 = vset.pattern.permute.xlu1 %v881_v0  ;;  %v213_v7 = vmax.f32 %v205_v3, 0.0  ;;  %v212_v9 = vld [vmem:[%s177_s29 + $0x38] sm:$0xff]  ;;  %v215_v10 = vmax.f32 %v207_v6, 0.0  ;;  %v218_v11 = vmax.f32 %v210_v8, 0.0  ;;  %v206_v13 = vld [vmem:[%s177_s29 + $0x8] sm:$0xff]  ;;  %s884_s17 = smov 127  }
  0x4c   : > { %v220_v12 = vmax.f32 %v212_v9, 0.0  ;;  %v208_v14 = vld [vmem:[%s177_s29 + $0x18] sm:$0xff]  ;;  %v1046_v15 = vpack.c.bf16 %v219_v5, %v217_v4  ;;  %v214_v16 = vmax.f32 %v206_v13, 0.0  ;;  %s885_s22 = smov 95   ;;  %s886_s23 = smov 96   ;;  %v366_v22 = vld [vmem:[%s1179_s2] sm:$0xff] }
  0x4d   : > { %v216_v17 = vmax.f32 %v208_v14, 0.0  ;;  %v1048_v18 = vpack.c.bf16 %v215_v10, %v213_v7  ;;  %s887_s25 = smov 110   ;;  %s888_s30 = smov 111   ;;  %v745_v21 = vld [vmem:[#allocation5 + $0x4] ss:$12 sps:$4 sm:$0xff]   ;;  %v367_v23 = vld [vmem:[%s1179_s2 + $0x8] sm:$0xff] }
  0x4e   : > { %263 = vrot.lane.b32.xlu0 %v1046_v15, %s882_s18  ;;  %v1051_v19 = vpack.c.bf16 %v220_v12, %v218_v11  ;;  %s889_s4 = smov 94   ;;  %459 = vmatprep.mubr.bf16.mxu0 %v745_v21  ;;  %v369_v24 = vld [vmem:[%s1179_s2 + $0x18] sm:$0xff]  ;;  %v368_v25 = vld [vmem:[%s1179_s2 + $0x10] sm:$0xff]  ;;  %vm267_vm0 = vcmask 916480   ;;  %vm252_vm1 = vcmask 1031168   ;;  %vm237_vm2 = vcmask 1039360  }
  0x4f   : > { %259 = vrot.lane.b32.xlu1 %v1048_v18, %s882_s18  ;;  %v1054_v20 = vpack.c.bf16 %v216_v17, %v214_v16  ;;  %vm330_vm3 = vcmask 777216   ;;  %vm312_vm4 = vcmask 785408   ;;  %vm297_vm5 = vcmask 900096   ;;  %v743_v16 = vld [vmem:[#allocation5] ss:$12 sps:$4 sm:$0xff]   ;;  %p1196_p11 = scmp.ne.s32.totalorder %s1190_s6, 0 }
  0x50   : > { %vm349_vm6 = vcmask 769024   ;;  %vm282_vm7 = vcmask 908288   ;;  %vm420_vm8 = vcmask 261120   ;;  %v750_v21 = vld [vmem:[#allocation5 + $0x20] ss:$12 sps:$4 sm:$0xff]  }
  0x52   : > { %265 = vrot.lane.b32.xlu0 %v1051_v19, %s882_s18 }
  0x53   : > { %261 = vrot.lane.b32.xlu1 %v1054_v20, %s882_s18  ;;  %s1113_s18 = scalar_lea.vmem [#allocation7], %s651_s27 }
  0x54   : > { %s560_s27 = sshll.u32 %s1113_s18, 4  ;;  %s1125_s27 = int_to_ptr.vmem [resolvable:$true] %s560_s27 }
  0x56   : > { %248 = vrot.lane.b32.xlu0 %v1046_v15, %s883_s20 }
  0x57   : > { %250 = vrot.lane.b32.xlu1 %v1051_v19, %s883_s20 }
  0x5a   : > { %244 = vrot.lane.b32.xlu0 %v1048_v18, %s883_s20 }
  0x5b   : > { %246 = vrot.lane.b32.xlu1 %v1054_v20, %s883_s20  ;;  %s668_s20 = sshll.u32 %s934_s16, 10  ;;  %s547_s16 = scalar_lea.sflag [#allocation4], %s1029_s26 }
  0x5e   : > { %233 = vrot.lane.b32.xlu0 %v1046_v15, %s884_s17 }
  0x5f   : > { %235 = vrot.lane.b32.xlu1 %v1051_v19, %s884_s17 }
  0x62   : > { %229 = vrot.lane.b32.xlu0 %v1048_v18, %s884_s17 }
  0x63   : > { %231 = vrot.lane.b32.xlu1 %v1054_v20, %s884_s17 }
  0x66   : > { %324 = vrot.lane.b32.xlu0 %v881_v0, %s885_s22 }
  0x67   : > { %328 = vrot.lane.b32.xlu1 %v1051_v19, %s885_s22 }
  0x6a   : > { %326 = vrot.lane.b32.xlu0 %v1046_v15, %s885_s22 }
  0x6b   : > { %322 = vrot.lane.b32.xlu1 %v1054_v20, %s885_s22 }
  0x6e   : > { %320 = vrot.lane.b32.xlu0 %v1048_v18, %s885_s22 }
  0x6f   : > { %308 = vrot.lane.b32.xlu1 %v1046_v15, %s886_s23 }
  0x72   : > { %310 = vrot.lane.b32.xlu0 %v1051_v19, %s886_s23 }
  0x73   : > { %304 = vrot.lane.b32.xlu1 %v1048_v18, %s886_s23 }
  0x76   : > { %306 = vrot.lane.b32.xlu0 %v1054_v20, %s886_s23  ;;  %s1132_s23 = scalar_lea.hbm %s1180_s3, %s668_s20 }
  0x77   : > { %293 = vrot.lane.b32.xlu1 %v1046_v15, %s887_s25 }
  0x7a   : > { %295 = vrot.lane.b32.xlu0 %v1051_v19, %s887_s25 }
  0x7b   : > { %289 = vrot.lane.b32.xlu1 %v1048_v18, %s887_s25 }
  0x7e   : > { %291 = vrot.lane.b32.xlu0 %v1054_v20, %s887_s25  ;;  %s805_s25 = scalar_lea.vmem %s1125_s27, 1024 }
  0x7f   : > { %278 = vrot.lane.b32.xlu1 %v1046_v15, %s888_s30  ;;  %p806_p3 = scmp.ne.s32.totalorder %s1125_s27, %s805_s25 }
  0x81   : > { %p807_p7 = pnand %p806_p3, %p1196_p11 }
  0x82   : > { %280 = vrot.lane.b32.xlu0 %v1051_v19, %s888_s30 }
  0x83   : > { %343 = vrot.lane.b32.xlu1 %v881_v0, %s889_s4  ;;  %p808_p12 = pneg %p807_p7 }
  0x86   : > { %347 = vrot.lane.b32.xlu0 %v1051_v19, %s889_s4 }
  0x87   : > { %345 = vrot.lane.b32.xlu1 %v1046_v15, %s889_s4 }
  0x8a   : > { %274 = vrot.lane.b32.xlu0 %v1048_v18, %s888_s30 }
  0x8b   : > { %276 = vrot.lane.b32.xlu1 %v1054_v20, %s888_s30  ;;  %s890_s30 = smov [#allocation7]  }
  0x8e   : > { %341 = vrot.lane.b32.xlu0 %v1054_v20, %s889_s4 }
  0x8f   : > { %339 = vrot.lane.b32.xlu1 %v1048_v18, %s889_s4  ;;  %s809_s4 = sshll.u32 %s890_s30, 4  ;;  %s810_s4 = int_to_ptr.vmem [resolvable:$false] %s809_s4 }
  0x90   : > { %s811_s7 = scalar_lea.vmem %s810_s4, 2048  ;;  %p812_p10 = scmp.lt.s32.totalorder %s1125_s27, %s810_s4 }
  0x91   : > { %p813_p2 = scmp.lt.s32.totalorder %s811_s7, %s805_s25 }
  0x92   : > { %372 = vperm.xlu0 %741, %v366_v22  }
  0x93   : > { %377 = vperm.xlu1 %742, %v367_v23   ;;  %p814_p13 = por %p813_p2, %p812_p10 }
  0x95   : > { %p815_p0 = pnand %p814_p13, %p808_p12 }
  0x96   : > { %387 = vperm.xlu0 %741, %v369_v24  }
  0x97   : > { %382 = vperm.xlu1 %742, %v368_v25  }
  0xc0   : > { %v264_v26 = vpop.permute.xlu0 %263 }
  0xc1   : > { %v260_v27 = vpop.permute.xlu1 %259 }
  0xc4   : > { %v266_v28 = vpop.permute.xlu0 %265 }
  0xc5   : > { %v262_v29 = vpop.permute.xlu1 %261  ;;  %427 = vmatprep.subr.bf16.mxu0 %v266_v28  ;;  %v269_v30 = vsel %vm267_vm0, %v264_v26, %v266_v28 }
  0xc6   : > { %428 = vmatpush1.bf16.msra.mxu0 %v269_v30  ;;  %v268_v33 = vsel %vm267_vm0, %v260_v27, %v262_v29 }
  0xc7   : > { %429 = vmatprep.subr.bf16.mxu0 %v262_v29 }
  0xc8   : > { %v249_v31 = vpop.permute.xlu0 %248 }
  0xc9   : > { %v251_v32 = vpop.permute.xlu1 %250 }
  0xca   : > { %430 = vmatpush1.bf16.msra.mxu0 %v268_v33  ;;  %v254_v36 = vsel %vm252_vm1, %v249_v31, %v251_v32 }
  0xcb   : > { %431 = vmatprep.subr.bf16.mxu0 %v251_v32 }
  0xcc   : > { %v245_v34 = vpop.permute.xlu0 %244 }
  0xcd   : > { %v247_v35 = vpop.permute.xlu1 %246 }
  0xce   : > { %432 = vmatpush1.bf16.msra.mxu0 %v254_v36  ;;  %v253_v39 = vsel %vm252_vm1, %v245_v34, %v247_v35 }
  0xcf   : > { %433 = vmatprep.subr.bf16.mxu0 %v247_v35 }
  0xd0   : > { %v234_v37 = vpop.permute.xlu0 %233 }
  0xd1   : > { %v236_v38 = vpop.permute.xlu1 %235 }
  0xd2   : > { %434 = vmatpush1.bf16.msra.mxu0 %v253_v39  ;;  %v239_v42 = vsel %vm237_vm2, %v234_v37, %v236_v38 }
  0xd3   : > { %435 = vmatprep.subr.bf16.mxu0 %v236_v38 }
  0xd4   : > { %v230_v40 = vpop.permute.xlu0 %229 }
  0xd5   : > { %v232_v41 = vpop.permute.xlu1 %231 }
  0xd6   : > { %436 = vmatpush1.bf16.msra.mxu0 %v239_v42  ;;  %v238_v45 = vsel %vm237_vm2, %v230_v40, %v232_v41 }
  0xd7   : > { %437 = vmatprep.subr.bf16.mxu0 %v232_v41 }
  0xd8   : > { %v325_v43 = vpop.permute.xlu0 %324 }
  0xd9   : > { %v329_v44 = vpop.permute.xlu1 %328 }
  0xda   : > { %438 = vmatpush1.bf16.msra.mxu0 %v238_v45  ;;  %v334_v50 = vsel %vm330_vm3, %v329_v44, %v325_v43 }
  0xdb   : > { %439 = vmatprep.subr.bf16.mxu0 %v1051_v19  ;;  %v747_v19 = vld [vmem:[#allocation5 + $0x1c] ss:$12 sps:$4 sm:$0xff]  }
  0xdc   : > { %v327_v46 = vpop.permute.xlu0 %326 }
  0xdd   : > { %v323_v47 = vpop.permute.xlu1 %322  ;;  %v333_v53 = vsel %vm330_vm3, %v327_v46, %v329_v44 }
  0xde   : > { %440 = vmatpush1.bf16.msra.mxu0 %v1046_v15  ;;  %v332_v54 = vsel %vm330_vm3, %v323_v47, %v325_v43 }
  0xdf   : > { %441 = vmatprep.subr.bf16.mxu0 %v1054_v20  ;;  %v749_v20 = vld [vmem:[#allocation5 + $0x18] ss:$12 sps:$4 sm:$0xff]  }
  0xe0   : > { %v321_v48 = vpop.permute.xlu0 %320 }
  0xe1   : > { %v309_v49 = vpop.permute.xlu1 %308  ;;  %v331_v57 = vsel %vm330_vm3, %v321_v48, %v323_v47 }
  0xe2   : > { %442 = vmatpush1.bf16.msra.mxu0 %v1048_v18  ;;  %v746_v18 = vld [vmem:[#allocation5 + $0x8] ss:$12 sps:$4 sm:$0xff]  }
  0xe3   : > { %443 = vmatprep.subr.bf16.mxu0 %v334_v50 }
  0xe4   : > { %v311_v51 = vpop.permute.xlu0 %310 }
  0xe5   : > { %v305_v52 = vpop.permute.xlu1 %304  ;;  %v314_v60 = vsel %vm312_vm4, %v309_v49, %v311_v51 }
  0xe6   : > { %444 = vmatpush2.bf16.msra.mxu0 %v333_v53 }
  0xe7   : > { %445 = vmatprep.subr.bf16.mxu0 %v332_v54 }
  0xe8   : > { %v307_v55 = vpop.permute.xlu0 %306 }
  0xe9   : > { %v294_v56 = vpop.permute.xlu1 %293  ;;  %v313_v63 = vsel %vm312_vm4, %v305_v52, %v307_v55 }
  0xea   : > { %446 = vmatpush2.bf16.msra.mxu0 %v331_v57 }
  0xeb   : > { %447 = vmatprep.subr.bf16.mxu0 %v311_v51 }
  0xec   : > { %v296_v58 = vpop.permute.xlu0 %295 }
  0xed   : > { %v290_v59 = vpop.permute.xlu1 %289  ;;  %v299_v3 = vsel %vm297_vm5, %v294_v56, %v296_v58 }
  0xee   : > { %448 = vmatpush2.bf16.msra.mxu0 %v314_v60 }
  0xef   : > { %449 = vmatprep.subr.bf16.mxu0 %v307_v55 }
  0xf0   : > { %v292_v61 = vpop.permute.xlu0 %291 }
  0xf1   : > { %v279_v62 = vpop.permute.xlu1 %278  ;;  %v298_v6 = vsel %vm297_vm5, %v290_v59, %v292_v61 }
  0xf2   : > { %450 = vmatpush2.bf16.msra.mxu0 %v313_v63 }
  0xf3   : > { %451 = vmatprep.subr.bf16.mxu0 %v296_v58 }
  0xf4   : > { %v281_v1 = vpop.permute.xlu0 %280 }
  0xf5   : > { %v344_v2 = vpop.permute.xlu1 %343  ;;  %v284_v11 = vsel %vm282_vm7, %v279_v62, %v281_v1 }
  0xf6   : > { %452 = vmatpush2.bf16.msra.mxu0 %v299_v3 }
  0xf7   : > { %453 = vmatprep.subr.bf16.mxu0 %v292_v61 }
  0xf8   : > { %v348_v4 = vpop.permute.xlu0 %347 }
  0xf9   : > { %v346_v5 = vpop.permute.xlu1 %345  ;;  %v353_v7 = vsel %vm349_vm6, %v348_v4, %v344_v2 }
  0xfa   : > { %454 = vmatpush2.bf16.msra.mxu0 %v298_v6  ;;  %492 = vmatprep.subr.bf16.mxu1 %v353_v7  ;;  %v352_v8 = vsel %vm349_vm6, %v346_v5, %v348_v4 }
  0xfb   : > { %455 = vmatprep.subr.bf16.mxu0 %v281_v1  ;;  %493 = vmatpush1.bf16.msra.mxu1 %v352_v8 }
  0xfc   : > { %v275_v9 = vpop.permute.xlu0 %274 }
  0xfd   : > { %v277_v10 = vpop.permute.xlu1 %276 }
  0xfe   : > { %456 = vmatpush2.bf16.msra.mxu0 %v284_v11  ;;  %v283_v14 = vsel %vm282_vm7, %v275_v9, %v277_v10 }
  0xff   : > { %457 = vmatprep.subr.bf16.mxu0 %v277_v10 }
 0x100   : > { %v342_v12 = vpop.permute.xlu0 %341 }
 0x101   : > { %v340_v13 = vpop.permute.xlu1 %339  ;;  %v351_v15 = vsel %vm349_vm6, %v342_v12, %v344_v2 }
 0x102   : > { %458 = vmatpush2.bf16.msra.mxu0 %v283_v14  ;;  %494 = vmatprep.subr.bf16.mxu1 %v351_v15  ;;  %v350_v17 = vsel %vm349_vm6, %v340_v13, %v342_v12 }
 0x103   : > { %495 = vmatpush1.bf16.msra.mxu1 %v350_v17 }
 0x105   : > { %460 = vmatmul.mubr.bf16.vlgmr.msra.gmra.mxu0 %v743_v16 }
 0x106   : > { %660 = vmatmul.mubr.msk.bf16.vlgmr.msra.gmra.mxu1 %vm420_vm8, %v746_v18  ;;  %469 = vmatprep.mubr.bf16.mxu0 %v747_v19 }
 0x107   : > { %522 = vmatprep.mubr.bf16.mxu1 %v881_v0 }
 0x10d   : > { %470 = vmatmul.mubr.bf16.gmra.mxu0 %v749_v20  ;;  %v373_v22 = vpop.permute.xlu0 %372 }
 0x10e   : > { %661 = vmatmul.mubr.msk.bf16.gmra.mxu1 %vm420_vm8, %v750_v21  ;;  %v378_v24 = vpop.permute.xlu1 %377 }
 0x111   : > { %v388_v49 = vpop.permute.xlu0 %387 }
 0x112   : > { %v383_v35 = vpop.permute.xlu1 %382 }
 0x1c5   : > { %v461_v23 = vpop.f32.mrf.mxu0 }
 0x1c6   : > { %v462_v25 = vadd.f32 %v461_v23, %v373_v22  ;;  %v514_v26 = vpop.f32.mrf.mxu1 }
 0x1c7   : > { %v463_v27 = vpop.f32.mrf.mxu0 }
 0x1c8   : > { %v515_v28 = vadd.f32 %v514_v26, %v462_v25  ;;  %v464_v29 = vadd.f32 %v463_v27, %v373_v22  ;;  %v516_v30 = vpop.f32.mrf.mxu1 }
 0x1c9   : > { %v465_v31 = vpop.f32.mrf.mxu0 }
 0x1ca   : > { %538 = vst [vmem:[%s1113_s18] sm:$0xff] %v515_v28  ;;  %v517_v0 = vadd.f32 %v516_v30, %v464_v29  ;;  %v466_v32 = vadd.f32 %v465_v31, %v378_v24  ;;  %v518_v33 = vpop.f32.mrf.mxu1 }
 0x1cb   : > { %v467_v34 = vpop.f32.mrf.mxu0 }
 0x1cc   : > { %v534_v36 = vsel %vm312_vm4, %v517_v0, 0.0  ;;  %v519_v37 = vadd.f32 %v518_v33, %v466_v32  ;;  %v468_v38 = vadd.f32 %v467_v34, %v378_v24  ;;  %v520_v39 = vpop.f32.mrf.mxu1 }
 0x1cd   : > { %539 = vst [vmem:[%s1113_s18 + $0x8] sm:$0xff] %v534_v36  ;;  %v471_v40 = vpop.f32.mrf.mxu0 }
 0x1ce   : > { %540 = vst [vmem:[%s1113_s18 + $0x10] sm:$0xff] %v519_v37  ;;  %v521_v41 = vadd.f32 %v520_v39, %v468_v38  ;;  %v472_v42 = vadd.f32 %v471_v40, %v383_v35  ;;  %v524_v43 = vpop.f32.mrf.mxu1 }
 0x1cf   : > { %v473_v44 = vpop.f32.mrf.mxu0 }
 0x1d0   : > { %v535_v45 = vsel %vm312_vm4, %v521_v41, 0.0  ;;  %v525_v46 = vadd.f32 %v524_v43, %v472_v42  ;;  %v474_v47 = vadd.f32 %v473_v44, %v383_v35  ;;  %v526_v48 = vpop.f32.mrf.mxu1 }
 0x1d1   : > { %541 = vst [vmem:[%s1113_s18 + $0x18] sm:$0xff] %v535_v45  ;;  %v475_v50 = vpop.f32.mrf.mxu0 }
 0x1d2   : > { %542 = vst [vmem:[%s1113_s18 + $0x20] sm:$0xff] %v525_v46  ;;  %v527_v51 = vadd.f32 %v526_v48, %v474_v47  ;;  %v476_v52 = vadd.f32 %v475_v50, %v388_v49  ;;  %v528_v53 = vpop.f32.mrf.mxu1 }
 0x1d3   : > { %v477_v54 = vpop.f32.mrf.mxu0 }
 0x1d4   : > { %v536_v55 = vsel %vm312_vm4, %v527_v51, 0.0  ;;  %v529_v56 = vadd.f32 %v528_v53, %v476_v52  ;;  %v478_v57 = vadd.f32 %v477_v54, %v388_v49  ;;  %v530_v58 = vpop.f32.mrf.mxu1 }
 0x1d5   : > { %543 = vst [vmem:[%s1113_s18 + $0x28] sm:$0xff] %v536_v55 }
 0x1d6   : > { %544 = vst [vmem:[%s1113_s18 + $0x30] sm:$0xff] %v529_v56  ;;  %v531_v59 = vadd.f32 %v530_v58, %v478_v57 }
 0x1d8   : > { %v537_v60 = vsel %vm312_vm4, %v531_v59, 0.0 }
 0x1d9   : > { %545 = vst [vmem:[%s1113_s18 + $0x38] sm:$0xff] %v537_v60 }
 0x1da   : > { %818 = shalt.err (!%p815_p0)
}
 0x1db   : > { %s819_s8 = scalar_lea.hbm %s1132_s23, 1024  ;;  %s823_s11 = scalar_lea.hbm %s1180_s3, 2048 }
 0x1dc   : > { %p820_p5 = scmp.ne.s32.totalorder %s1132_s23, %s819_s8  ;;  %p824_p4 = scmp.lt.s32.totalorder %s1132_s23, %s1180_s3 }
 0x1dd   : > { %p825_p6 = scmp.lt.s32.totalorder %s823_s11, %s819_s8 }
 0x1de   : > { %p821_p9 = pnand %p820_p5, %p1196_p11 }
 0x1df   : > { %p826_p8 = por %p825_p6, %p824_p4 }
 0x1e0   : > { %p822_p1 = pneg %p821_p9 }
 0x1e2   : > { %p827_p3 = pnand %p826_p8, %p822_p1 }
 0x1e4   : > { %830 = shalt.err (!%p827_p3)
}
 0x1e5   : > { %s891_s29 = smov 256   ;;  %s892_s18 = smov 16  }
 0x1e6   : > { %675 = dma.vmem_to_hbm [thread:$0]  (%p1196_p11), %s1125_s27, 1024, %s1132_s23, %s547_s16, %s891_s29, %s891_s29, %s892_s18  }
 0x1e7 PF: > { %s575_s20 = sand.u32 1, %s861_s12   ;;  %p1197_p7 = scmp.ne.s32.totalorder %s1186_s19, 0 }
 0x1e8   : > { %p1198_p12 = scmp.ge.s32.totalorder %s873_s15, 2  ;;  %s576_s17 = scalar_lea.sflag [#allocation4], %s575_s20 }
 0x1ea   : > { %p686_p10 = pnand %p1198_p12, %p1197_p7 }
 0x1ec   : > { %p687_p2 = pneg %p686_p10 }
 0x1ee   : > { %856 = dma.done.wait (%p687_p2), %s576_s17, 1024  }
 0x1ef   : > { %858 = vsyncadd (%p687_p2), %s576_s17, 4294966272  ;;  %p17_p13 = scmp.ge.s32.totalorder %s967_s24, 4   ;;  %s1199_s12 = smov %s865_s13 }
 0x1f0   : > { %s1200_s13 = smov %s869_s14  ;;  %s1201_s14 = smov %s984_s5 }
 0x1f1   : > { %s1202_s15 = smov %s967_s24  ;;  %19 = sbr.rel (!%p17_p13) target bundleno = 6 (0x6), region = 81 }
 0x1f6   :  { %581 = vsyncpa [#allocation3], 1 }
 0x1f7   :  { %583 = vsyncpa [#allocation3 + $0x1], 1 }
 0x1f8   :  { %584 = vsyncpa [#allocation6], 1 }
 0x1f9   :  { %585 = vsyncpa [#allocation4], 1 }
 0x1fa   :  { %587 = vsyncpa [#allocation4 + $0x1], 1 }

</bundles_post_ra>
